<compile_context>
chip_gen: v7x
topology: tpu7x:2x2x1
jax: 0.10.0
libtpu: 0.0.40
codegen_flags: <defaults>
</compile_context>

<pallas_src>
import jax
import jax.numpy as jnp
from jax.experimental import pallas as pl
from jax.experimental.pallas import tpu as pltpu


def _round_up(x, m):
    return ((x + m - 1) // m) * m


def _recurrent_linear_kernel(alpha_ref, fc7_ref, refine_ref, out_ref):
    # alpha_ref: SMEM (1,1) f32 scalar; fc7/refine/out: VMEM tiles.
    alpha = alpha_ref[0, 0]                 # f32 scalar
    one_minus_alpha = 1.0 - alpha           # hoisted scalar algebra

    fc7 = fc7_ref[...].astype(jnp.float32)
    refine = refine_ref[...].astype(jnp.float32)

    # One fma + one mul per element; blend in f32, cast once on store.
    blend = alpha * refine + one_minus_alpha
    out_ref[...] = (fc7 * blend).astype(out_ref.dtype)


def _choose_tiles(B, F, dtype, target_tile_bytes):
    """Pick (block_rows, block_cols) targeting ~target_tile_bytes per operand."""
    itemsize = jnp.dtype(dtype).itemsize
    row_align = {4: 8, 2: 16, 1: 32}.get(itemsize, 8)   # sublane packing

    # Feature (lane) axis: large multiple of 128, or the full dim if F isn't
    # 128-aligned (full-extent last dim is always a legal block dim).
    if F % 128 == 0:
        block_cols = min(F, 4096)
    else:
        block_cols = F

    # Row axis: fill the tile budget, aligned to the sublane packing.
    rows_budget = max(1, target_tile_bytes // (block_cols * itemsize))
    if B <= row_align:
        block_rows = B                                   # full-extent dim
    else:
        block_rows = max(row_align, (rows_budget // row_align) * row_align)
        block_rows = min(block_rows, _round_up(B, row_align))
    return block_rows, block_cols


def recurrent_linear(fc7, recurrent_refine, alpha, *,
                     block_rows=None, block_cols=None,
                     target_tile_bytes=2 * 1024 * 1024):
    """output = fc7 * (1 - alpha + alpha * recurrent_refine)

    fc7, recurrent_refine: (B, F) arrays of the same shape/dtype.
    alpha: scalar (python float, 0-d or (1,) array).
    """
    assert fc7.shape == recurrent_refine.shape, "inputs must match"
    assert fc7.ndim == 2, "expected (batch, features)"
    B, F = fc7.shape
    dtype = fc7.dtype

    auto_rows, auto_cols = _choose_tiles(B, F, dtype, target_tile_bytes)
    if block_rows is None:
        block_rows = auto_rows
    if block_cols is None:
        block_cols = auto_cols

    alpha_arr = jnp.asarray(alpha, dtype=jnp.float32).reshape(1, 1)

    grid = (pl.cdiv(B, block_rows), pl.cdiv(F, block_cols))

    # VMEM budget: 3 streams x double-buffered tiles, with headroom.
    itemsize = jnp.dtype(dtype).itemsize
    tile_bytes = block_rows * block_cols * itemsize
    vmem_needed = 3 * 2 * tile_bytes
    vmem_limit = int(min(max(vmem_needed * 3 // 2 + (4 << 20), 16 << 20),
                         48 << 20))

    return pl.pallas_call(
        _recurrent_linear_kernel,
        out_shape=jax.ShapeDtypeStruct((B, F), dtype),
        grid=grid,
        in_specs=[
            pl.BlockSpec(memory_space=pltpu.SMEM),                    # alpha
            pl.BlockSpec((block_rows, block_cols), lambda i, j: (i, j)),  # fc7
            pl.BlockSpec((block_rows, block_cols), lambda i, j: (i, j)),  # refine
        ],
        out_specs=pl.BlockSpec((block_rows, block_cols), lambda i, j: (i, j)),
        compiler_params=pltpu.CompilerParams(
            dimension_semantics=("parallel", "parallel"),
            vmem_limit_bytes=vmem_limit,
        ),
    )(alpha_arr, fc7, recurrent_refine)


# TODO(synk): backward pass (grad_input = grad_output * (1 - alpha + alpha*refine))
# is not implemented here; only the forward semantics of RecurrentFunction.


if __name__ == "__main__":
    key = jax.random.PRNGKey(0)
    k1, k2, k3, k4 = jax.random.split(key, 4)

    # Small fc7-style feature map: (batch, features). Single-block fast path.
    B, F = 16, 256
    fc7 = jax.random.normal(k1, (B, F), dtype=jnp.float32)
    recurrent_refine = jax.random.normal(k2, (B, F), dtype=jnp.float32)
    alpha = jnp.float32(0.3)

    out = jax.block_until_ready(recurrent_linear(fc7, recurrent_refine, alpha))
    ref = fc7 * (1.0 - alpha + alpha * recurrent_refine)
    assert out.shape == (B, F) and out.dtype == fc7.dtype
    assert jnp.allclose(out, ref, atol=1e-6, rtol=1e-6)

    # Ragged batch + multi-block grid path (forces partial edge blocks).
    B2, F2 = 144, 384
    fc7b = jax.random.normal(k3, (B2, F2), dtype=jnp.float32)
    refb = jax.random.normal(k4, (B2, F2), dtype=jnp.float32)
    out2 = jax.block_until_ready(
        recurrent_linear(fc7b, refb, 0.7, target_tile_bytes=64 * 1024))
    ref2 = fc7b * (1.0 - 0.7 + 0.7 * refb)
    assert jnp.allclose(out2, ref2, atol=1e-6, rtol=1e-6)

    # bf16 inputs: blend computed in f32 in-kernel, result cast back to bf16.
    fc7h = fc7.astype(jnp.bfloat16)
    refh = recurrent_refine.astype(jnp.bfloat16)
    out3 = jax.block_until_ready(recurrent_linear(fc7h, refh, alpha))
    ref3 = (fc7h.astype(jnp.float32)
            * (1.0 - alpha + alpha * refh.astype(jnp.float32)))
    assert out3.dtype == jnp.bfloat16
    assert jnp.allclose(out3.astype(jnp.float32), ref3, atol=1e-2, rtol=1e-2)

    print("KERNEL_OK")
</pallas_src>

<mosaic_0001>
module attributes {stable_mosaic.version = 11 : i64} {
  func.func @_recurrent_linear_kernel(%arg0: i32, %arg1: i32, %arg2: memref<1x1xf32, #tpu.memory_space<smem>>, %arg3: memref<16x256xf32, #tpu.memory_space<vmem>>, %arg4: memref<16x256xf32, #tpu.memory_space<vmem>>, %arg5: memref<16x256xf32, #tpu.memory_space<vmem>>) attributes {dimension_semantics = [#tpu.dimension_semantics<parallel>, #tpu.dimension_semantics<parallel>], iteration_bounds = array<i64: 1, 1>, scalar_prefetch = 0 : i64, scratch_operands = 0 : i64, tpu.core_type = #tpu.core_type<tc>, window_params = [{transform_indices = @transform_0, window_bounds = array<i64: 1, 1>}, {transform_indices = @transform_1, window_bounds = array<i64: 16, 256>}, {transform_indices = @transform_2, window_bounds = array<i64: 16, 256>}, {transform_indices = @transform_3, window_bounds = array<i64: 16, 256>}]} {
    %c0 = arith.constant 0 : index
    %c0_0 = arith.constant 0 : index
    %0 = memref.load %arg2[%c0, %c0_0] : memref<1x1xf32, #tpu.memory_space<smem>>
    %cst = arith.constant 1.000000e+00 : f32
    %1 = arith.subf %cst, %0 : f32
    %c0_1 = arith.constant 0 : index
    %c0_2 = arith.constant 0 : index
    %2 = vector.load %arg3[%c0_1, %c0_2] : memref<16x256xf32, #tpu.memory_space<vmem>>, vector<16x256xf32>
    %c0_3 = arith.constant 0 : index
    %c0_4 = arith.constant 0 : index
    %3 = vector.load %arg4[%c0_3, %c0_4] : memref<16x256xf32, #tpu.memory_space<vmem>>, vector<16x256xf32>
    %4 = vector.broadcast %0 : f32 to vector<16x256xf32>
    %5 = arith.mulf %4, %3 : vector<16x256xf32>
    %6 = vector.broadcast %1 : f32 to vector<16x256xf32>
    %7 = arith.addf %5, %6 : vector<16x256xf32>
    %8 = arith.mulf %2, %7 : vector<16x256xf32>
    %c0_5 = arith.constant 0 : index
    %c0_6 = arith.constant 0 : index
    %9 = vector.load %arg5[%c0_5, %c0_6] : memref<16x256xf32, #tpu.memory_space<vmem>>, vector<16x256xf32>
    tpu.vector_store %arg5[%c0_5, %c0_6], %8 {strides = array<i32>} : memref<16x256xf32, #tpu.memory_space<vmem>>, vector<16x256xf32>,
    return
  }
  func.func @transform_0(%arg0: i32, %arg1: i32) -> (i32, i32) {
    %c0_i32 = arith.constant 0 : i32
    %c0_i32_0 = arith.constant 0 : i32
    %c0_i32_1 = arith.constant 0 : i32
    return %c0_i32, %c0_i32_0 : i32, i32
  }
  func.func @transform_1(%arg0: i32, %arg1: i32) -> (i32, i32) {
    %c0_i32 = arith.constant 0 : i32
    return %arg0, %arg1 : i32, i32
  }
  func.func @transform_2(%arg0: i32, %arg1: i32) -> (i32, i32) {
    %c0_i32 = arith.constant 0 : i32
    return %arg0, %arg1 : i32, i32
  }
  func.func @transform_3(%arg0: i32, %arg1: i32) -> (i32, i32) {
    %c0_i32 = arith.constant 0 : i32
    return %arg0, %arg1 : i32, i32
  }
}

</mosaic_0001>

<bundles_post_ra>
// kernel: tpu_custom_call.1
= control target key start
LH: loop header
LB: loop body
LE: loop exit
PB: predicated region body
PF: predicated region fallthrough
CT: control target
= control target key end

     0   :  { %9 = vsyncpa [#allocation4], 0  ;;  %s243_s0 = inlined_call_operand.<no memory space> [shape: f32[1,1], index: 0, kind: input, shape index: {}]   ;;  %s244_s1 = inlined_call_operand.hbm [shape: f32[16,256], index: 1, kind: input, shape index: {}]   ;;  %s245_s2 = inlined_call_operand.hbm [shape: f32[16,256], index: 2, kind: input, shape index: {}]   ;;  %s246_s3 = inlined_call_operand.hbm [shape: f32[16,256], index: 3, kind: output, shape index: {}]  }
   0x1   :  { %10 = vsyncpa [#allocation7], 0 }
   0x2   :  { %11 = vsyncpa [#allocation5], 0  ;;  %s167_s12 = smov [#allocation3]   ;;  %s95_s16 = scalar_lea.hbm %s244_s1, 512 }
   0x3   :  { %s19_s13 = sshll.u32 %s167_s12, 4  ;;  %p96_p0 = scmp.ne.s32.totalorder %s244_s1, %s95_s16  ;;  %s20_s13 = int_to_ptr.vmem [resolvable:$true] %s19_s13 }
   0x4   :  { %p99_p1 = scmp.lt.u32.totalorder %s95_s16, %s244_s1 }
   0x6   :  { %p101_p2 = pnand %p99_p1, %p96_p0 }
   0x8   :  { %104 = shalt.err (!%p101_p2)
}
   0x9   :  { %s105_s21 = scalar_lea.vmem %s20_s13, 512  ;;  %p110_p4 = scmp.lt.s32.totalorder %s20_s13, %s20_s13 }
   0xa   :  { %p106_p3 = scmp.ne.s32.totalorder %s20_s13, %s105_s21  ;;  %p111_p5 = scmp.lt.s32.totalorder %s105_s21, %s105_s21 }
   0xc   :  { %p112_p6 = por %p111_p5, %p110_p4 }
   0xe   :  { %p113_p7 = pnand %p112_p6, %p106_p3 }
  0x10   :  { %116 = shalt.err (!%p113_p7)
}
  0x11   :  { %s168_s22 = smov 256   ;;  %s169_s23 = smov 16  }
  0x12   :  { %25 = dma.hbm_to_vmem [thread:$0]  %s244_s1, 512, %s20_s13, [#allocation4], %s168_s22, %s168_s22, %s169_s23  }
  0x13   :  { %s170_s26 = smov [#allocation6]   ;;  %s117_s30 = scalar_lea.hbm %s245_s2, 512 }
  0x14   :  { %s31_s27 = sshll.u32 %s170_s26, 4  ;;  %p118_p8 = scmp.ne.s32.totalorder %s245_s2, %s117_s30  ;;  %s32_s27 = int_to_ptr.vmem [resolvable:$true] %s31_s27 }
  0x15   :  { %p121_p9 = scmp.lt.u32.totalorder %s117_s30, %s245_s2 }
  0x17   :  { %p123_p10 = pnand %p121_p9, %p118_p8 }
  0x19   :  { %126 = shalt.err (!%p123_p10)
}
  0x1a   :  { %s127_s8 = scalar_lea.vmem %s32_s27, 512  ;;  %p132_p12 = scmp.lt.s32.totalorder %s32_s27, %s32_s27 }
  0x1b   :  { %p128_p11 = scmp.ne.s32.totalorder %s32_s27, %s127_s8  ;;  %p133_p13 = scmp.lt.s32.totalorder %s127_s8, %s127_s8 }
  0x1d   :  { %p134_p0 = por %p133_p13, %p132_p12 }
  0x1f   :  { %p135_p1 = pnand %p134_p0, %p128_p11 }
  0x21   :  { %138 = shalt.err (!%p135_p1)
}
  0x22   :  { %37 = dma.hbm_to_vmem [thread:$0]  %s245_s2, 512, %s32_s27, [#allocation7], %s168_s22, %s168_s22, %s169_s23  }
  0x23   :  { %161 = dma.done.wait [#allocation4], 512  }
  0x24   :  { %162 = vsyncadd [#allocation4], 4294966784 }
  0x25   :  { %163 = dma.done.wait [#allocation7], 512  }
  0x26   :  { %164 = vsyncadd [#allocation7], 4294966784  ;;  %s45_s12 = ssub.f32 1.0, %s243_s0  ;;  %v54_v0 = vstv %s243_s0  ;;  %v50_v1 = vld [vmem:[#allocation6] sm:$0xff]  ;;  %v51_v4 = vld [vmem:[#allocation6 + $0x8] sm:$0xff]  ;;  %s171_s2 = smov [#allocation8]  }
  0x27   :  { %v55_v3 = vmul.f32 %v54_v0, %v50_v1  ;;  %v52_v5 = vld [vmem:[#allocation6 + $0x10] sm:$0xff]  ;;  %v46_v6 = vld [vmem:[#allocation3] sm:$0xff]  ;;  %v56_v7 = vmul.f32 %v54_v0, %v51_v4  ;;  %v53_v9 = vld [vmem:[#allocation6 + $0x18] sm:$0xff]  ;;  %s77_s15 = sshll.u32 %s171_s2, 4  ;;  %s78_s15 = int_to_ptr.vmem [resolvable:$true] %s77_s15 }
  0x28   :  { %v59_v2 = vstv %s45_s12  ;;  %v57_v8 = vmul.f32 %v54_v0, %v52_v5  ;;  %v47_v11 = vld [vmem:[#allocation3 + $0x8] sm:$0xff]  ;;  %v48_v12 = vld [vmem:[#allocation3 + $0x10] sm:$0xff]  ;;  %v58_v13 = vmul.f32 %v54_v0, %v53_v9  ;;  %v49_v16 = vld [vmem:[#allocation3 + $0x18] sm:$0xff]  ;;  %s139_s0 = scalar_lea.vmem %s78_s15, 512  ;;  %p144_p3 = scmp.lt.s32.totalorder %s78_s15, %s78_s15 }
  0x29   :  { %v60_v10 = vadd.f32 %v59_v2, %v55_v3  ;;  %v61_v14 = vadd.f32 %v59_v2, %v56_v7  ;;  %p140_p2 = scmp.ne.s32.totalorder %s78_s15, %s139_s0  ;;  %p145_p4 = scmp.lt.s32.totalorder %s139_s0, %s139_s0 }
  0x2a   :  { %v62_v15 = vadd.f32 %v59_v2, %v57_v8  ;;  %v63_v18 = vadd.f32 %v59_v2, %v58_v13 }
  0x2b   :  { %v64_v17 = vmul.f32 %v60_v10, %v46_v6  ;;  %v65_v19 = vmul.f32 %v61_v14, %v47_v11  ;;  %p146_p5 = por %p145_p4, %p144_p3 }
  0x2c   :  { %v66_v20 = vmul.f32 %v62_v15, %v48_v12  ;;  %v67_v21 = vmul.f32 %v63_v18, %v49_v16 }
  0x2d   :  { %68 = vst [vmem:[#allocation8] sm:$0xff] %v64_v17  ;;  %69 = vst [vmem:[#allocation8 + $0x8] sm:$0xff] %v65_v19  ;;  %p147_p6 = pnand %p146_p5, %p140_p2 }
  0x2e   :  { %70 = vst [vmem:[#allocation8 + $0x10] sm:$0xff] %v66_v20  ;;  %71 = vst [vmem:[#allocation8 + $0x18] sm:$0xff] %v67_v21 }
  0x2f   :  { %150 = shalt.err (!%p147_p6)
}
  0x30   :  { %s151_s18 = scalar_lea.hbm %s246_s3, 512 }
  0x31   :  { %p152_p7 = scmp.ne.s32.totalorder %s246_s3, %s151_s18  ;;  %p155_p8 = scmp.lt.u32.totalorder %s151_s18, %s246_s3 }
  0x33   :  { %p157_p9 = pnand %p155_p8, %p152_p7 }
  0x35   :  { %160 = shalt.err (!%p157_p9)
}
  0x36   :  { %83 = dma.vmem_to_hbm [thread:$0]  %s78_s15, 512, %s246_s3, [#allocation5], %s168_s22, %s168_s22, %s169_s23  }
  0x37   :  { %165 = dma.done.wait [#allocation5], 512  }
  0x38   :  { %166 = vsyncadd [#allocation5], 4294966784 }
  0x39   :  { %87 = vsyncpa [#allocation4], 1 }
  0x3a   :  { %88 = vsyncpa [#allocation7], 1 }
  0x3b   :  { %89 = vsyncpa [#allocation5], 1 }

</bundles_post_ra>
